<compile_context>
chip_gen: v7x
topology: tpu7x:2x2x1
jax: 0.10.0
libtpu: 0.0.40
codegen_flags: <defaults>
</compile_context>

<pallas_src>
import math

import numpy as np
import jax
import jax.numpy as jnp
from jax.experimental import pallas as pl
from jax.experimental.pallas import tpu as pltpu

HP = jax.lax.Precision.HIGHEST  # only used for the (host-side) reference / exact folding


# ----------------------- geometric algebra setup (host-side glue) -----------------------
def build_cayley(n: int) -> np.ndarray:
    """Cayley table of the euclidean Clifford algebra Cl(n, 0).

    cayley[i, j, k] = coefficient of blade e_j in the geometric product e_i * e_k.
    Blades are ordered by (grade, lexicographic).
    """
    dim = 1 << n
    masks = sorted(range(dim), key=lambda m: (bin(m).count("1"), m))
    idx = {m: i for i, m in enumerate(masks)}

    def reorder_sign(a: int, b: int) -> float:
        s, t = 0, a >> 1
        while t:
            s += bin(t & b).count("1")
            t >>= 1
        return -1.0 if (s & 1) else 1.0

    cayley = np.zeros((dim, dim, dim), dtype=np.float32)
    for a in range(dim):
        for b in range(dim):
            cayley[idx[a], idx[a ^ b], idx[b]] = reorder_sign(a, b)  # e_i^2 = +1
    return cayley


def build_pair_expansion_constants(B, S, D):
    """Constant 0/1 matrices used inside the kernel (all tiny, built once on host)."""
    P, BS = B * S * S, B * S
    rq = np.zeros((P, BS), np.float32)    # row repeat : pair (b,m,n) <- q row (b,m)
    rk = np.zeros((P, BS), np.float32)    # row tile   : pair (b,m,n) <- k row (b,n)
    rsum = np.zeros((BS, P), np.float32)  # gathers the S scores of query (b,m)
    mask = np.zeros((P, S), np.float32)   # places pair (b,m,n)'s score in lane n
    for p in range(P):
        b, m, n = p // (S * S), (p // S) % S, p % S
        rq[p, b * S + m] = 1.0
        rk[p, b * S + n] = 1.0
        rsum[b * S + m, p] = 1.0
        mask[p, n] = 1.0
    e = np.zeros((D, D * D), np.float32)  # lane repeat-each: column i*D+k <- element i
    f = np.zeros((D, D * D), np.float32)  # lane tile       : column i*D+k <- element k
    for i in range(D):
        for kk in range(D):
            e[i, i * D + kk] = 1.0
            f[kk, i * D + kk] = 1.0
    return rq, rk, rsum, mask, e, f


# ------------------------------------ Pallas kernel -------------------------------------
def ga_self_attention_kernel(q_ref, k_ref, v_ref,
                             rq_ref, rk_ref, e_ref, f_ref, rsum_ref, mask_ref,
                             wf_ref, b1_ref, w2_ref, b2_ref, w3_ref, b3_ref,
                             out_ref, probs_ref):
    B, S, D = q_ref.shape

    q2 = q_ref[...].reshape(B * S, D)                                       # (B*S, D)
    k2 = k_ref[...].reshape(B * S, D)                                       # (B*S, D)

    # Pair-row expansion (rows = (b, m, n)) via constant 0/1 matmuls.
    qe = jnp.dot(rq_ref[...], q2, preferred_element_type=jnp.float32)       # (B*S*S, D)
    ke = jnp.dot(rk_ref[...], k2, preferred_element_type=jnp.float32)       # (B*S*S, D)
    # Lane expansion: qrep[p, i*D+k] = qe[p, i], krep[p, i*D+k] = ke[p, k].
    qrep = jnp.dot(qe, e_ref[...], preferred_element_type=jnp.float32)      # (B*S*S, D*D)
    krep = jnp.dot(ke, f_ref[...], preferred_element_type=jnp.float32)      # (B*S*S, D*D)
    pair = qrep * krep                                                      # outer products

    # Score MLP; Cayley is pre-folded into wf, so geometric product + layer-1 is one
    # lane-dense matmul (default MXU precision, f32 accumulation).
    h = jnp.dot(pair, wf_ref[...], preferred_element_type=jnp.float32) + b1_ref[...]
    h = jnp.maximum(h, 0.0)
    h = jnp.dot(h, w2_ref[...], preferred_element_type=jnp.float32) + b2_ref[...]
    h = jnp.maximum(h, 0.0)
    # Width-1 third layer: VPU multiply + lane reduction (keeps the MXU off a 1-wide dot).
    sc = jnp.sum(h * w3_ref[...], axis=-1, keepdims=True) + b3_ref[...]     # (B*S*S, 1)

    # Move scores to a (B*S, S) layout with the key index on lanes using a mask + 0/1
    # matmul (avoids a sublane->lane reshape), so softmax and the probs store are
    # lane-oriented.
    sc_t = jnp.dot(rsum_ref[...], sc * mask_ref[...],
                   preferred_element_type=jnp.float32)                      # (B*S, S)

    # Softmax over the key axis (lanes); reciprocal goes to the EUP slot.
    mx = jnp.max(sc_t, axis=-1, keepdims=True)
    ex = jnp.exp(sc_t - mx)
    den = jnp.sum(ex, axis=-1, keepdims=True)
    probs = ex * pl.reciprocal(den, approx=True)                            # (B*S, S)
    probs_ref[...] = probs

    # Faithful to torch.einsum('bqk,bvd->bqd', attn_probs, v): BOTH 'k' and 'v' are
    # summed-out free indices, so the result factorizes.
    rowsum = jnp.sum(probs, axis=-1, keepdims=True)                         # (B*S, 1)
    vsum = jnp.sum(v_ref[...], axis=1, keepdims=True)                       # (B, 1, D)
    out_ref[...] = rowsum.reshape(B, S, 1) * vsum                           # (B, S, D)


# ---------------------------------- shared glue helpers ---------------------------------
def layer_norm(t, eps=1e-5):
    mu = jnp.mean(t, axis=-1, keepdims=True)
    var = jnp.mean((t - mu) ** 2, axis=-1, keepdims=True)
    return (t - mu) / jnp.sqrt(var + eps)


def mv_linear(t, w_rep):
    # MVLinear (subspaces=True): out[b, n, i] = sum_m t[b, m, i] * w_rep[n, m, i]
    # (its bias is initialized to zero, hence omitted)
    return jnp.einsum("bmi,nmi->bni", t, w_rep)


# ------------------------------------ wrapper (glue) ------------------------------------
def self_attention_ga(x, params, cayley):
    B, S, D = x.shape
    H = params["w1"].shape[1]

    v = x @ params["wv"] + params["bv"]                 # nn.Linear v_proj
    q = layer_norm(mv_linear(x, params["wq_rep"]))      # LayerNorm(MVLinear q)
    k = layer_norm(mv_linear(x, params["wk_rep"]))      # LayerNorm(MVLinear k)

    # Fold the Cayley table into the first MLP weight (exact: each (i,k) selects a single
    # signed row of w1), so the geometric product + layer-1 becomes one matmul in-kernel.
    wfused = jnp.einsum("ijk,jh->ikh", cayley, params["w1"],
                        precision=HP).reshape(D * D, H)                     # (D*D, H)
    w3row = params["w3"].reshape(1, H)

    rq, rk, rsum, mask, e, f = (jnp.asarray(c) for c in
                                build_pair_expansion_constants(B, S, D))

    args = (q, k, v, rq, rk, e, f, rsum, mask,
            wfused, params["b1"], params["w2"], params["b2"], w3row, params["b3"])

    def full(shape):
        return pl.BlockSpec(shape, lambda i, _n=len(shape): (0,) * _n)

    out, probs2d = pl.pallas_call(
        ga_self_attention_kernel,
        out_shape=(
            jax.ShapeDtypeStruct((B, S, D), jnp.float32),
            jax.ShapeDtypeStruct((B * S, S), jnp.float32),   # lane-oriented probs slab
        ),
        grid=(1,),   # batch folded into the pair rows: a single kernel invocation
        in_specs=[full(a.shape) for a in args],
        out_specs=(full((B, S, D)), full((B * S, S))),
        compiler_params=pltpu.CompilerParams(dimension_semantics=("arbitrary",)),
    )(*args)

    # Layout plumbing only (free in XLA): present probs as (B, S, S, 1) like the module.
    return out, probs2d.reshape(B, S, S, 1)


# ---------------------------------- reference (pure JAX) --------------------------------
def reference_forward(x, params, cayley):
    v = x @ params["wv"] + params["bv"]
    q = layer_norm(mv_linear(x, params["wq_rep"]))
    k = layer_norm(mv_linear(x, params["wk_rep"]))
    gp = jnp.einsum("bmi,ijk,bnk->bmnj", q, cayley, k, precision=HP)
    h = jax.nn.relu(jnp.dot(gp, params["w1"], precision=HP) + params["b1"])
    h = jax.nn.relu(jnp.dot(h, params["w2"], precision=HP) + params["b2"])
    scores = (jnp.dot(h, params["w3"], precision=HP) + params["b3"])[..., 0]
    probs = jax.nn.softmax(scores, axis=-1)
    out = jnp.einsum("bqk,bvd->bqd", probs, v)
    return out, probs[..., None]


# -------------------------------------- parameters --------------------------------------
def init_params(key, S, D, H, subspaces):
    n_sub = len(subspaces)
    ks = jax.random.split(key, 9)
    # MVLinear(seq_length, seq_length) weights: (out=S, in=S, n_subspaces), std 1/sqrt(S),
    # repeat-interleaved over the blade dimension according to subspace sizes.
    wq_sub = jax.random.normal(ks[0], (S, S, n_sub), jnp.float32) / math.sqrt(S)
    wk_sub = jax.random.normal(ks[1], (S, S, n_sub), jnp.float32) / math.sqrt(S)
    rep = lambda w: jnp.asarray(np.repeat(np.asarray(w), subspaces, axis=-1))
    return dict(
        wq_rep=rep(wq_sub),                                                   # (S, S, D)
        wk_rep=rep(wk_sub),                                                   # (S, S, D)
        wv=jax.random.normal(ks[2], (D, D), jnp.float32) / math.sqrt(D),      # v_proj
        bv=jax.random.normal(ks[3], (D,), jnp.float32) * 0.05,
        w1=jax.random.normal(ks[4], (D, H), jnp.float32) / math.sqrt(D),      # att_prj[0]
        b1=jax.random.normal(ks[5], (1, H), jnp.float32) * 0.05,
        w2=jax.random.normal(ks[6], (H, H), jnp.float32) / math.sqrt(H),      # att_prj[2]
        b2=jax.random.normal(ks[7], (1, H), jnp.float32) * 0.05,
        w3=jax.random.normal(ks[8], (H, 1), jnp.float32) / math.sqrt(H),      # att_prj[4]
        b3=jnp.zeros((1, 1), jnp.float32),
    )


if __name__ == "__main__":
    n = 3                       # Cl(3,0): 8-dimensional multivectors
    D = 1 << n                  # embed_dim == number of blades
    B, S, H = 2, 8, 32          # batch, seq_length, hidden_dim

    cayley_np = build_cayley(n)                                   # (D, D, D)
    subspaces = [math.comb(n, g) for g in range(n + 1)]           # [1, 3, 3, 1]
    cayley = jnp.asarray(cayley_np)

    key = jax.random.PRNGKey(0)
    kx, kp = jax.random.split(key)
    x = jax.random.normal(kx, (B, S, D), dtype=jnp.float32)
    params = init_params(kp, S, D, H, subspaces)

    out, probs = self_attention_ga(x, params, cayley)
    out = jax.block_until_ready(out)
    probs = jax.block_until_ready(probs)

    ref_out, ref_probs = reference_forward(x, params, cayley)
    assert out.shape == (B, S, D) and probs.shape == (B, S, S, 1)
    # Kernel uses native single-pass MXU precision (bf16 inputs, f32 accumulate) like the
    # torch fp16-autocast path, so compare against the f32 HIGHEST reference with a
    # correspondingly relaxed tolerance on the softmax-normalized probs.
    np.testing.assert_allclose(np.asarray(probs), np.asarray(ref_probs), rtol=2e-2, atol=2e-2)
    np.testing.assert_allclose(np.asarray(out), np.asarray(ref_out), rtol=5e-3, atol=5e-3)
    print("KERNEL_OK")
</pallas_src>

<mosaic_0001>
module attributes {stable_mosaic.version = 11 : i64} {
  func.func @ga_self_attention_kernel(%arg0: i32, %arg1: memref<2x8x8xf32, #tpu.memory_space<vmem>>, %arg2: memref<2x8x8xf32, #tpu.memory_space<vmem>>, %arg3: memref<2x8x8xf32, #tpu.memory_space<vmem>>, %arg4: memref<128x16xf32, #tpu.memory_space<vmem>>, %arg5: memref<128x16xf32, #tpu.memory_space<vmem>>, %arg6: memref<8x64xf32, #tpu.memory_space<vmem>>, %arg7: memref<8x64xf32, #tpu.memory_space<vmem>>, %arg8: memref<16x128xf32, #tpu.memory_space<vmem>>, %arg9: memref<128x8xf32, #tpu.memory_space<vmem>>, %arg10: memref<64x32xf32, #tpu.memory_space<vmem>>, %arg11: memref<1x32xf32, #tpu.memory_space<vmem>>, %arg12: memref<32x32xf32, #tpu.memory_space<vmem>>, %arg13: memref<1x32xf32, #tpu.memory_space<vmem>>, %arg14: memref<1x32xf32, #tpu.memory_space<vmem>>, %arg15: memref<1x1xf32, #tpu.memory_space<vmem>>, %arg16: memref<2x8x8xf32, #tpu.memory_space<vmem>>, %arg17: memref<16x8xf32, #tpu.memory_space<vmem>>) attributes {dimension_semantics = [#tpu.dimension_semantics<arbitrary>], iteration_bounds = array<i64: 1>, scalar_prefetch = 0 : i64, scratch_operands = 0 : i64, tpu.core_type = #tpu.core_type<tc>, window_params = [{pipeline_mode = #tpu.pipeline_mode<synchronous>, transform_indices = @transform_0, window_bounds = array<i64: 2, 8, 8>}, {pipeline_mode = #tpu.pipeline_mode<synchronous>, transform_indices = @transform_1, window_bounds = array<i64: 2, 8, 8>}, {pipeline_mode = #tpu.pipeline_mode<synchronous>, transform_indices = @transform_2, window_bounds = array<i64: 2, 8, 8>}, {pipeline_mode = #tpu.pipeline_mode<synchronous>, transform_indices = @transform_3, window_bounds = array<i64: 128, 16>}, {pipeline_mode = #tpu.pipeline_mode<synchronous>, transform_indices = @transform_4, window_bounds = array<i64: 128, 16>}, {pipeline_mode = #tpu.pipeline_mode<synchronous>, transform_indices = @transform_5, window_bounds = array<i64: 8, 64>}, {pipeline_mode = #tpu.pipeline_mode<synchronous>, transform_indices = @transform_6, window_bounds = array<i64: 8, 64>}, {pipeline_mode = #tpu.pipeline_mode<synchronous>, transform_indices = @transform_7, window_bounds = array<i64: 16, 128>}, {pipeline_mode = #tpu.pipeline_mode<synchronous>, transform_indices = @transform_8, window_bounds = array<i64: 128, 8>}, {pipeline_mode = #tpu.pipeline_mode<synchronous>, transform_indices = @transform_9, window_bounds = array<i64: 64, 32>}, {pipeline_mode = #tpu.pipeline_mode<synchronous>, transform_indices = @transform_10, window_bounds = array<i64: 1, 32>}, {pipeline_mode = #tpu.pipeline_mode<synchronous>, transform_indices = @transform_11, window_bounds = array<i64: 32, 32>}, {pipeline_mode = #tpu.pipeline_mode<synchronous>, transform_indices = @transform_12, window_bounds = array<i64: 1, 32>}, {pipeline_mode = #tpu.pipeline_mode<synchronous>, transform_indices = @transform_13, window_bounds = array<i64: 1, 32>}, {pipeline_mode = #tpu.pipeline_mode<synchronous>, transform_indices = @transform_14, window_bounds = array<i64: 1, 1>}, {pipeline_mode = #tpu.pipeline_mode<synchronous>, transform_indices = @transform_15, window_bounds = array<i64: 2, 8, 8>}, {pipeline_mode = #tpu.pipeline_mode<synchronous>, transform_indices = @transform_16, window_bounds = array<i64: 16, 8>}]} {
    %c0 = arith.constant 0 : index
    %c0_0 = arith.constant 0 : index
    %c0_1 = arith.constant 0 : index
    %0 = vector.load %arg1[%c0, %c0_0, %c0_1] : memref<2x8x8xf32, #tpu.memory_space<vmem>>, vector<2x8x8xf32>
    %1 = vector.shape_cast %0 : vector<2x8x8xf32> to vector<16x8xf32>
    %c0_2 = arith.constant 0 : index
    %c0_3 = arith.constant 0 : index
    %c0_4 = arith.constant 0 : index
    %2 = vector.load %arg2[%c0_2, %c0_3, %c0_4] : memref<2x8x8xf32, #tpu.memory_space<vmem>>, vector<2x8x8xf32>
    %3 = vector.shape_cast %2 : vector<2x8x8xf32> to vector<16x8xf32>
    %c0_5 = arith.constant 0 : index
    %c0_6 = arith.constant 0 : index
    %4 = vector.load %arg4[%c0_5, %c0_6] : memref<128x16xf32, #tpu.memory_space<vmem>>, vector<128x16xf32>
    %cst = arith.constant dense<0.000000e+00> : vector<128x8xf32>
    %5 = tpu.matmul %4, %1, %cst {dimension_numbers = #tpu.dot_dimension_numbers<[1], [0], [0], [1], [0, 0, 1, 1], [], []>} : vector<128x16xf32>, vector<16x8xf32>, vector<128x8xf32> -> vector<128x8xf32>
    %c0_7 = arith.constant 0 : index
    %c0_8 = arith.constant 0 : index
    %6 = vector.load %arg5[%c0_7, %c0_8] : memref<128x16xf32, #tpu.memory_space<vmem>>, vector<128x16xf32>
    %cst_9 = arith.constant dense<0.000000e+00> : vector<128x8xf32>
    %7 = tpu.matmul %6, %3, %cst_9 {dimension_numbers = #tpu.dot_dimension_numbers<[1], [0], [0], [1], [0, 0, 1, 1], [], []>} : vector<128x16xf32>, vector<16x8xf32>, vector<128x8xf32> -> vector<128x8xf32>
    %c0_10 = arith.constant 0 : index
    %c0_11 = arith.constant 0 : index
    %8 = vector.load %arg6[%c0_10, %c0_11] : memref<8x64xf32, #tpu.memory_space<vmem>>, vector<8x64xf32>
    %cst_12 = arith.constant dense<0.000000e+00> : vector<128x64xf32>
    %9 = tpu.matmul %5, %8, %cst_12 {dimension_numbers = #tpu.dot_dimension_numbers<[1], [0], [0], [1], [0, 0, 1, 1], [], []>} : vector<128x8xf32>, vector<8x64xf32>, vector<128x64xf32> -> vector<128x64xf32>
    %c0_13 = arith.constant 0 : index
    %c0_14 = arith.constant 0 : index
    %10 = vector.load %arg7[%c0_13, %c0_14] : memref<8x64xf32, #tpu.memory_space<vmem>>, vector<8x64xf32>
    %cst_15 = arith.constant dense<0.000000e+00> : vector<128x64xf32>
    %11 = tpu.matmul %7, %10, %cst_15 {dimension_numbers = #tpu.dot_dimension_numbers<[1], [0], [0], [1], [0, 0, 1, 1], [], []>} : vector<128x8xf32>, vector<8x64xf32>, vector<128x64xf32> -> vector<128x64xf32>
    %12 = arith.mulf %9, %11 : vector<128x64xf32>
    %c0_16 = arith.constant 0 : index
    %c0_17 = arith.constant 0 : index
    %13 = vector.load %arg10[%c0_16, %c0_17] : memref<64x32xf32, #tpu.memory_space<vmem>>, vector<64x32xf32>
    %cst_18 = arith.constant dense<0.000000e+00> : vector<128x32xf32>
    %14 = tpu.matmul %12, %13, %cst_18 {dimension_numbers = #tpu.dot_dimension_numbers<[1], [0], [0], [1], [0, 0, 1, 1], [], []>} : vector<128x64xf32>, vector<64x32xf32>, vector<128x32xf32> -> vector<128x32xf32>
    %c0_19 = arith.constant 0 : index
    %c0_20 = arith.constant 0 : index
    %15 = vector.load %arg11[%c0_19, %c0_20] : memref<1x32xf32, #tpu.memory_space<vmem>>, vector<1x32xf32>
    %16 = vector.broadcast %15 : vector<1x32xf32> to vector<128x32xf32>
    %17 = arith.addf %14, %16 : vector<128x32xf32>
    %cst_21 = arith.constant 0.000000e+00 : f32
    %18 = vector.broadcast %cst_21 : f32 to vector<128x32xf32>
    %19 = arith.maximumf %17, %18 : vector<128x32xf32>
    %c0_22 = arith.constant 0 : index
    %c0_23 = arith.constant 0 : index
    %20 = vector.load %arg12[%c0_22, %c0_23] : memref<32x32xf32, #tpu.memory_space<vmem>>, vector<32x32xf32>
    %cst_24 = arith.constant dense<0.000000e+00> : vector<128x32xf32>
    %21 = tpu.matmul %19, %20, %cst_24 {dimension_numbers = #tpu.dot_dimension_numbers<[1], [0], [0], [1], [0, 0, 1, 1], [], []>} : vector<128x32xf32>, vector<32x32xf32>, vector<128x32xf32> -> vector<128x32xf32>
    %c0_25 = arith.constant 0 : index
    %c0_26 = arith.constant 0 : index
    %22 = vector.load %arg13[%c0_25, %c0_26] : memref<1x32xf32, #tpu.memory_space<vmem>>, vector<1x32xf32>
    %23 = vector.broadcast %22 : vector<1x32xf32> to vector<128x32xf32>
    %24 = arith.addf %21, %23 : vector<128x32xf32>
    %cst_27 = arith.constant 0.000000e+00 : f32
    %25 = vector.broadcast %cst_27 : f32 to vector<128x32xf32>
    %26 = arith.maximumf %24, %25 : vector<128x32xf32>
    %c0_28 = arith.constant 0 : index
    %c0_29 = arith.constant 0 : index
    %27 = vector.load %arg14[%c0_28, %c0_29] : memref<1x32xf32, #tpu.memory_space<vmem>>, vector<1x32xf32>
    %28 = vector.broadcast %27 : vector<1x32xf32> to vector<128x32xf32>
    %29 = arith.mulf %26, %28 : vector<128x32xf32>
    %cst_30 = arith.constant dense<0.000000e+00> : vector<128xf32>
    %30 = vector.multi_reduction <add>, %29, %cst_30 [1] : vector<128x32xf32> to vector<128xf32>
    %31 = vector.shape_cast %30 : vector<128xf32> to vector<128x1xf32>
    %c0_31 = arith.constant 0 : index
    %c0_32 = arith.constant 0 : index
    %32 = vector.load %arg15[%c0_31, %c0_32] : memref<1x1xf32, #tpu.memory_space<vmem>>, vector<1x1xf32>
    %33 = vector.broadcast %32 : vector<1x1xf32> to vector<128x1xf32>
    %34 = arith.addf %31, %33 : vector<128x1xf32>
    %c0_33 = arith.constant 0 : index
    %c0_34 = arith.constant 0 : index
    %35 = vector.load %arg8[%c0_33, %c0_34] : memref<16x128xf32, #tpu.memory_space<vmem>>, vector<16x128xf32>
    %c0_35 = arith.constant 0 : index
    %c0_36 = arith.constant 0 : index
    %36 = vector.load %arg9[%c0_35, %c0_36] : memref<128x8xf32, #tpu.memory_space<vmem>>, vector<128x8xf32>
    %37 = vector.broadcast %34 : vector<128x1xf32> to vector<128x8xf32>
    %38 = arith.mulf %37, %36 : vector<128x8xf32>
    %cst_37 = arith.constant dense<0.000000e+00> : vector<16x8xf32>
    %39 = tpu.matmul %35, %38, %cst_37 {dimension_numbers = #tpu.dot_dimension_numbers<[1], [0], [0], [1], [0, 0, 1, 1], [], []>} : vector<16x128xf32>, vector<128x8xf32>, vector<16x8xf32> -> vector<16x8xf32>
    %cst_38 = arith.constant dense<0xFF800000> : vector<16xf32>
    %40 = vector.multi_reduction <maximumf>, %39, %cst_38 [1] : vector<16x8xf32> to vector<16xf32>
    %41 = vector.shape_cast %40 : vector<16xf32> to vector<16x1xf32>
    %42 = vector.broadcast %41 : vector<16x1xf32> to vector<16x8xf32>
    %43 = arith.subf %39, %42 : vector<16x8xf32>
    %44 = math.exp %43 : vector<16x8xf32>
    %cst_39 = arith.constant dense<0.000000e+00> : vector<16xf32>
    %45 = vector.multi_reduction <add>, %44, %cst_39 [1] : vector<16x8xf32> to vector<16xf32>
    %46 = vector.shape_cast %45 : vector<16xf32> to vector<16x1xf32>
    %47 = tpu.reciprocal %46 {approx = true} : vector<16x1xf32> -> vector<16x1xf32>
    %48 = vector.broadcast %47 : vector<16x1xf32> to vector<16x8xf32>
    %49 = arith.mulf %44, %48 : vector<16x8xf32>
    %c0_40 = arith.constant 0 : index
    %c0_41 = arith.constant 0 : index
    %50 = vector.load %arg17[%c0_40, %c0_41] : memref<16x8xf32, #tpu.memory_space<vmem>>, vector<16x8xf32>
    tpu.vector_store %arg17[%c0_40, %c0_41], %49 {strides = array<i32>} : memref<16x8xf32, #tpu.memory_space<vmem>>, vector<16x8xf32>,
    %cst_42 = arith.constant dense<0.000000e+00> : vector<16xf32>
    %51 = vector.multi_reduction <add>, %49, %cst_42 [1] : vector<16x8xf32> to vector<16xf32>
    %52 = vector.shape_cast %51 : vector<16xf32> to vector<16x1xf32>
    %c0_43 = arith.constant 0 : index
    %c0_44 = arith.constant 0 : index
    %c0_45 = arith.constant 0 : index
    %53 = vector.load %arg3[%c0_43, %c0_44, %c0_45] : memref<2x8x8xf32, #tpu.memory_space<vmem>>, vector<2x8x8xf32>
    %cst_46 = arith.constant dense<0.000000e+00> : vector<2x8xf32>
    %54 = vector.multi_reduction <add>, %53, %cst_46 [1] : vector<2x8x8xf32> to vector<2x8xf32>
    %55 = vector.shape_cast %54 : vector<2x8xf32> to vector<2x1x8xf32>
    %56 = vector.shape_cast %52 : vector<16x1xf32> to vector<2x8x1xf32>
    %57 = vector.broadcast %56 : vector<2x8x1xf32> to vector<2x8x8xf32>
    %58 = vector.broadcast %55 : vector<2x1x8xf32> to vector<2x8x8xf32>
    %59 = arith.mulf %57, %58 : vector<2x8x8xf32>
    %c0_47 = arith.constant 0 : index
    %c0_48 = arith.constant 0 : index
    %c0_49 = arith.constant 0 : index
    %60 = vector.load %arg16[%c0_47, %c0_48, %c0_49] : memref<2x8x8xf32, #tpu.memory_space<vmem>>, vector<2x8x8xf32>
    tpu.vector_store %arg16[%c0_47, %c0_48, %c0_49], %59 {strides = array<i32>} : memref<2x8x8xf32, #tpu.memory_space<vmem>>, vector<2x8x8xf32>,
    return
  }
  func.func @transform_0(%arg0: i32) -> (i32, i32, i32) {
    %c0_i32 = arith.constant 0 : i32
    %c0_i32_0 = arith.constant 0 : i32
    %c0_i32_1 = arith.constant 0 : i32
    %c0_i32_2 = arith.constant 0 : i32
    return %c0_i32, %c0_i32_0, %c0_i32_1 : i32, i32, i32
  }
  func.func @transform_1(%arg0: i32) -> (i32, i32, i32) {
    %c0_i32 = arith.constant 0 : i32
    %c0_i32_0 = arith.constant 0 : i32
    %c0_i32_1 = arith.constant 0 : i32
    %c0_i32_2 = arith.constant 0 : i32
    return %c0_i32, %c0_i32_0, %c0_i32_1 : i32, i32, i32
  }
  func.func @transform_2(%arg0: i32) -> (i32, i32, i32) {
    %c0_i32 = arith.constant 0 : i32
    %c0_i32_0 = arith.constant 0 : i32
    %c0_i32_1 = arith.constant 0 : i32
    %c0_i32_2 = arith.constant 0 : i32
    return %c0_i32, %c0_i32_0, %c0_i32_1 : i32, i32, i32
  }
  func.func @transform_3(%arg0: i32) -> (i32, i32) {
    %c0_i32 = arith.constant 0 : i32
    %c0_i32_0 = arith.constant 0 : i32
    %c0_i32_1 = arith.constant 0 : i32
    return %c0_i32, %c0_i32_0 : i32, i32
  }
  func.func @transform_4(%arg0: i32) -> (i32, i32) {
    %c0_i32 = arith.constant 0 : i32
    %c0_i32_0 = arith.constant 0 : i32
    %c0_i32_1 = arith.constant 0 : i32
    return %c0_i32, %c0_i32_0 : i32, i32
  }
  func.func @transform_5(%arg0: i32) -> (i32, i32) {
    %c0_i32 = arith.constant 0 : i32
    %c0_i32_0 = arith.constant 0 : i32
    %c0_i32_1 = arith.constant 0 : i32
    return %c0_i32, %c0_i32_0 : i32, i32
  }
  func.func @transform_6(%arg0: i32) -> (i32, i32) {
    %c0_i32 = arith.constant 0 : i32
    %c0_i32_0 = arith.constant 0 : i32
    %c0_i32_1 = arith.constant 0 : i32
    return %c0_i32, %c0_i32_0 : i32, i32
  }
  func.func @transform_7(%arg0: i32) -> (i32, i32) {
    %c0_i32 = arith.constant 0 : i32
    %c0_i32_0 = arith.constant 0 : i32
    %c0_i32_1 = arith.constant 0 : i32
    return %c0_i32, %c0_i32_0 : i32, i32
  }
  func.func @transform_8(%arg0: i32) -> (i32, i32) {
    %c0_i32 = arith.constant 0 : i32
    %c0_i32_0 = arith.constant 0 : i32
    %c0_i32_1 = arith.constant 0 : i32
    return %c0_i32, %c0_i32_0 : i32, i32
  }
  func.func @transform_9(%arg0: i32) -> (i32, i32) {
    %c0_i32 = arith.constant 0 : i32
    %c0_i32_0 = arith.constant 0 : i32
    %c0_i32_1 = arith.constant 0 : i32
    return %c0_i32, %c0_i32_0 : i32, i32
  }
  func.func @transform_10(%arg0: i32) -> (i32, i32) {
    %c0_i32 = arith.constant 0 : i32
    %c0_i32_0 = arith.constant 0 : i32
    %c0_i32_1 = arith.constant 0 : i32
    return %c0_i32, %c0_i32_0 : i32, i32
  }
  func.func @transform_11(%arg0: i32) -> (i32, i32) {
    %c0_i32 = arith.constant 0 : i32
    %c0_i32_0 = arith.constant 0 : i32
    %c0_i32_1 = arith.constant 0 : i32
    return %c0_i32, %c0_i32_0 : i32, i32
  }
  func.func @transform_12(%arg0: i32) -> (i32, i32) {
    %c0_i32 = arith.constant 0 : i32
    %c0_i32_0 = arith.constant 0 : i32
    %c0_i32_1 = arith.constant 0 : i32
    return %c0_i32, %c0_i32_0 : i32, i32
  }
  func.func @transform_13(%arg0: i32) -> (i32, i32) {
    %c0_i32 = arith.constant 0 : i32
    %c0_i32_0 = arith.constant 0 : i32
    %c0_i32_1 = arith.constant 0 : i32
    return %c0_i32, %c0_i32_0 : i32, i32
  }
  func.func @transform_14(%arg0: i32) -> (i32, i32) {
    %c0_i32 = arith.constant 0 : i32
    %c0_i32_0 = arith.constant 0 : i32
    %c0_i32_1 = arith.constant 0 : i32
    return %c0_i32, %c0_i32_0 : i32, i32
  }
  func.func @transform_15(%arg0: i32) -> (i32, i32, i32) {
    %c0_i32 = arith.constant 0 : i32
    %c0_i32_0 = arith.constant 0 : i32
    %c0_i32_1 = arith.constant 0 : i32
    %c0_i32_2 = arith.constant 0 : i32
    return %c0_i32, %c0_i32_0, %c0_i32_1 : i32, i32, i32
  }
  func.func @transform_16(%arg0: i32) -> (i32, i32) {
    %c0_i32 = arith.constant 0 : i32
    %c0_i32_0 = arith.constant 0 : i32
    %c0_i32_1 = arith.constant 0 : i32
    return %c0_i32, %c0_i32_0 : i32, i32
  }
}

</mosaic_0001>

<bundles_post_ra>
// kernel: tpu_custom_call.1
= control target key start
LH: loop header
LB: loop body
LE: loop exit
PB: predicated region body
PF: predicated region fallthrough
CT: control target
= control target key end

     0   :  { %s2720_s0 = inlined_call_operand.vmem [shape: f32[2,8,8], index: 0, kind: input, shape index: {}]   ;;  %s2721_s1 = inlined_call_operand.vmem [shape: f32[2,8,8], index: 1, kind: input, shape index: {}]   ;;  %s2722_s2 = inlined_call_operand.vmem [shape: f32[2,8,8], index: 2, kind: input, shape index: {}]   ;;  %s2723_s3 = inlined_call_operand.vmem [shape: f32[128,16], index: 3, kind: input, shape index: {}]   ;;  %s2724_s4 = inlined_call_operand.vmem [shape: f32[128,16], index: 4, kind: input, shape index: {}]   ;;  %s2725_s5 = inlined_call_operand.vmem [shape: f32[8,64], index: 5, kind: input, shape index: {}]   ;;  %s2726_s6 = inlined_call_operand.vmem [shape: f32[8,64], index: 6, kind: input, shape index: {}]   ;;  %s2727_s7 = inlined_call_operand.vmem [shape: f32[16,128], index: 7, kind: input, shape index: {}]   ;;  %s2728_s8 = inlined_call_operand.vmem [shape: f32[128,8], index: 8, kind: input, shape index: {}]   ;;  %s2729_s9 = inlined_call_operand.vmem [shape: f32[64,32], index: 9, kind: input, shape index: {}]   ;;  %s2730_s10 = inlined_call_operand.vmem [shape: f32[1,32], index: 10, kind: input, shape index: {}]   ;;  %s2731_s11 = inlined_call_operand.vmem [shape: f32[32,32], index: 11, kind: input, shape index: {}]   ;;  %s2732_s12 = inlined_call_operand.vmem [shape: f32[1,32], index: 12, kind: input, shape index: {}]   ;;  %s2733_s13 = inlined_call_operand.vmem [shape: f32[1,32], index: 13, kind: input, shape index: {}]   ;;  %s2734_s14 = inlined_call_operand.<no memory space> [shape: f32[1,1], index: 14, kind: input, shape index: {}]   ;;  %s2735_s15 = inlined_call_operand.hbm [shape: f32[2,8,8], index: 15, kind: output, shape index: {0}]   ;;  %s2736_s16 = inlined_call_operand.vmem [shape: f32[16,8], index: 16, kind: output, shape index: {1}]  }
   0x1   :  { %2738 = sst [smem:[#allocation6_spill]] %s2720_s0  ;;  %v22_v0 = vstv %s2734_s14 }
   0x2   :  { %23 = vst [vmem:[#allocation2] sm:$0x1] %v22_v0 }
   0x3   :  { %s2739_s25 = sld [smem:[#allocation6_spill]]  ;;  %v57_v3 = vld [vmem:[%s2721_s1] sm:$0xff]  ;;  %vm75_vm0 = vcmask 130048   ;;  %v58_v5 = vld [vmem:[%s2721_s1 + $0x8] sm:$0xff]  ;;  %v61_v11 = vld [vmem:[%s2723_s3 + $0x10] sm:$0xff] }
   0x4   :  { %v59_v6 = vld [vmem:[%s2723_s3] sm:$0xff]  ;;  %v2133_v8 = vpack.c.bf16 %v58_v5, %v57_v3  ;;  %v60_v9 = vld [vmem:[%s2723_s3 + $0x8] sm:$0xff]  ;;  %v271_v12 = vld [vmem:[%s2724_s4 + $0x10] sm:$0xff] }
   0x5   :  { %v269_v7 = vld [vmem:[%s2724_s4] sm:$0xff]  ;;  %1918 = vmatprep.mubr.msk.f32.mxu0 %vm75_vm0, %v59_v6  ;;  %v270_v10 = vld [vmem:[%s2724_s4 + $0x8] sm:$0xff]  ;;  %v62_v13 = vld [vmem:[%s2723_s3 + $0x18] sm:$0xff] }
   0x6   :  { %1946 = vmatprep.mubr.msk.f32.mxu1 %vm75_vm0, %v269_v7  ;;  %2134 = vmatprep.subr.bf16.mxu1 %v2133_v8  ;;  %v272_v14 = vld [vmem:[%s2724_s4 + $0x18] sm:$0xff]  ;;  %v63_v15 = vld [vmem:[%s2723_s3 + $0x20] sm:$0xff]  ;;  %v64_v17 = vld [vmem:[%s2723_s3 + $0x28] sm:$0xff] }
   0x7   :  { %2136 = vmatpush3.bf16.msra.mxu1 %v2133_v8  ;;  %v273_v16 = vld [vmem:[%s2724_s4 + $0x20] sm:$0xff] }
   0x8   :  { %v478_v18 = vld [vmem:[%s2725_s5] sm:$0xff] }
   0x9   :  { %v55_v1 = vld [vmem:[%s2739_s25] sm:$0xff]  ;;  %v56_v2 = vld [vmem:[%s2739_s25 + $0x8] sm:$0xff] }
   0xa   :  { %v2129_v4 = vpack.c.bf16 %v56_v2, %v55_v1  ;;  %1947 = vmatmul.mubr.msk.f32.vlgmr.msra.gmra.mrb[0].mxu1 %vm75_vm0, %v270_v10  ;;  %v673_v19 = vld [vmem:[%s2726_s6] sm:$0xff] }
   0xb   :  { %1949 = vmatprep.mubr.msk.f32.mxu1 %vm75_vm0, %v271_v12 }
   0xc   :  { %2130 = vmatprep.subr.bf16.mxu0 %v2129_v4 }
   0xd   :  { %2132 = vmatpush3.bf16.msra.mxu0 %v2129_v4 }
   0xe   :  { %1950 = vmatmul.mubr.msk.f32.gmra.mrb[2].mxu1 %vm75_vm0, %v272_v14 }
  0x10   :  { %1919 = vmatmul.mubr.msk.f32.vlgmr.msra.gmra.mrb[0].mxu0 %vm75_vm0, %v60_v9 }
  0x11   :  { %1921 = vmatprep.mubr.msk.f32.mxu0 %vm75_vm0, %v61_v11 }
  0x14   :  { %1922 = vmatmul.mubr.msk.f32.gmra.mrb[2].mxu0 %vm75_vm0, %v62_v13 }
  0x15   :  { %1924 = vmatprep.mubr.msk.f32.mxu0 %vm75_vm0, %v63_v15 }
  0x16   :  { %24 = vsyncpa [#allocation4], 0  ;;  %1952 = vmatprep.mubr.msk.f32.mxu1 %vm75_vm0, %v273_v16  ;;  %v274_v20 = vld [vmem:[%s2724_s4 + $0x28] sm:$0xff]  ;;  %v65_v21 = vld [vmem:[%s2723_s3 + $0x30] sm:$0xff]  ;;  %1970 = vmatprep.subr.mxu0 %v478_v18  ;;  %vm479_vm1 = vcmask 64512   ;;  %vm898_vm2 = vcmask 523264  }
  0x17   :  { %v275_v22 = vld [vmem:[%s2724_s4 + $0x30] sm:$0xff]  ;;  %1996 = vmatprep.subr.mxu1 %v673_v19  ;;  %1971 = vmatpush3.msra.mxu0 %v478_v18  ;;  %v66_v23 = vld [vmem:[%s2723_s3 + $0x38] sm:$0xff]  ;;  %v67_v25 = vld [vmem:[%s2723_s3 + $0x40] sm:$0xff]  ;;  %vm1119_vm3 = vcmask 261120  }
  0x18   :  { %1925 = vmatmul.mubr.msk.f32.gmra.mrb[4].mxu0 %vm75_vm0, %v64_v17  ;;  %1997 = vmatpush3.msra.mxu1 %v673_v19  ;;  %v276_v24 = vld [vmem:[%s2724_s4 + $0x38] sm:$0xff]  ;;  %v277_v26 = vld [vmem:[%s2724_s4 + $0x40] sm:$0xff]  ;;  %v68_v27 = vld [vmem:[%s2723_s3 + $0x48] sm:$0xff] }
  0x19   :  { %1953 = vmatmul.mubr.msk.f32.gmra.mrb[4].mxu1 %vm75_vm0, %v274_v20  ;;  %1927 = vmatprep.mubr.msk.f32.mxu0 %vm75_vm0, %v65_v21  ;;  %v278_v28 = vld [vmem:[%s2724_s4 + $0x48] sm:$0xff]  ;;  %v69_v29 = vld [vmem:[%s2723_s3 + $0x50] sm:$0xff]  ;;  %v70_v31 = vld [vmem:[%s2723_s3 + $0x58] sm:$0xff] }
  0x1a   :  { %1955 = vmatprep.mubr.msk.f32.mxu1 %vm75_vm0, %v275_v22  ;;  %v279_v30 = vld [vmem:[%s2724_s4 + $0x50] sm:$0xff]  ;;  %v280_v32 = vld [vmem:[%s2724_s4 + $0x58] sm:$0xff]  ;;  %v71_v33 = vld [vmem:[%s2723_s3 + $0x60] sm:$0xff] }
  0x1b   :  { %v281_v34 = vld [vmem:[%s2724_s4 + $0x60] sm:$0xff]  ;;  %v72_v35 = vld [vmem:[%s2723_s3 + $0x68] sm:$0xff]  ;;  %v73_v37 = vld [vmem:[%s2723_s3 + $0x70] sm:$0xff] }
  0x1c   :  { %1928 = vmatmul.mubr.msk.f32.gmra.mrb[6].mxu0 %vm75_vm0, %v66_v23  ;;  %v282_v36 = vld [vmem:[%s2724_s4 + $0x68] sm:$0xff]  ;;  %v283_v38 = vld [vmem:[%s2724_s4 + $0x70] sm:$0xff]  ;;  %v74_v39 = vld [vmem:[%s2723_s3 + $0x78] sm:$0xff] }
  0x1d   :  { %1956 = vmatmul.mubr.msk.f32.gmra.mrb[6].mxu1 %vm75_vm0, %v276_v24  ;;  %1930 = vmatprep.mubr.msk.f32.mxu0 %vm75_vm0, %v67_v25  ;;  %v284_v40 = vld [vmem:[%s2724_s4 + $0x78] sm:$0xff]  ;;  %v883_v41 = vld [vmem:[%s2729_s9] sm:$0xff]  ;;  %v884_v42 = vld [vmem:[%s2729_s9 + $0x8] sm:$0xff] }
  0x1e   :  { %1958 = vmatprep.mubr.msk.f32.mxu1 %vm75_vm0, %v277_v26  ;;  %v2137_v43 = vpack.c.bf16 %v884_v42, %v883_v41  ;;  %v885_v44 = vld [vmem:[%s2729_s9 + $0x10] sm:$0xff]  ;;  %v886_v45 = vld [vmem:[%s2729_s9 + $0x18] sm:$0xff]  ;;  %v887_v51 = vld [vmem:[%s2729_s9 + $0x20] sm:$0xff] }
  0x1f   :  { %v2141_v49 = vpack.c.bf16 %v886_v45, %v885_v44  ;;  %v888_v52 = vld [vmem:[%s2729_s9 + $0x28] sm:$0xff]  ;;  %v889_v58 = vld [vmem:[%s2729_s9 + $0x30] sm:$0xff]  ;;  %v890_v59 = vld [vmem:[%s2729_s9 + $0x38] sm:$0xff] }
  0x20   :  { %1931 = vmatmul.mubr.msk.f32.gmra.mrb[8].mxu0 %vm75_vm0, %v68_v27  ;;  %2138 = vmatprep.subr.bf16.mxu0 %v2137_v43  ;;  %v2145_v56 = vpack.c.bf16 %v888_v52, %v887_v51  ;;  %v2149_v63 = vpack.c.bf16 %v890_v59, %v889_v58  ;;  %v1108_v21 = vld [vmem:[%s2731_s11] sm:$0xff]  ;;  %v1109_v22 = vld [vmem:[%s2731_s11 + $0x8] sm:$0xff]  ;;  %v1110_v23 = vld [vmem:[%s2731_s11 + $0x10] sm:$0xff] }
  0x21   :  { %1959 = vmatmul.mubr.msk.f32.gmra.mrb[8].mxu1 %vm75_vm0, %v278_v28  ;;  %1933 = vmatprep.mubr.msk.f32.mxu0 %vm75_vm0, %v69_v29  ;;  %v2153_v24 = vpack.c.bf16 %v1109_v22, %v1108_v21  ;;  %v1111_v25 = vld [vmem:[%s2731_s11 + $0x18] sm:$0xff] }
  0x22   :  { %1961 = vmatprep.mubr.msk.f32.mxu1 %vm75_vm0, %v279_v30  ;;  %v2157_v26 = vpack.c.bf16 %v1111_v25, %v1110_v23 }
  0x23   :  { %2154 = vmatprep.subr.bf16.mxu1 %v2153_v24 }
  0x24   :  { %1934 = vmatmul.mubr.msk.f32.gmra.mrb[10].mxu0 %vm75_vm0, %v70_v31 }
  0x25   :  { %1962 = vmatmul.mubr.msk.f32.gmra.mrb[10].mxu1 %vm75_vm0, %v280_v32  ;;  %1936 = vmatprep.mubr.msk.f32.mxu0 %vm75_vm0, %v71_v33 }
  0x26   :  { %1964 = vmatprep.mubr.msk.f32.mxu1 %vm75_vm0, %v281_v34 }
  0x28   :  { %1937 = vmatmul.mubr.msk.f32.gmra.mrb[12].mxu0 %vm75_vm0, %v72_v35 }
  0x29   :  { %1965 = vmatmul.mubr.msk.f32.gmra.mrb[12].mxu1 %vm75_vm0, %v282_v36  ;;  %1939 = vmatprep.mubr.msk.f32.mxu0 %vm75_vm0, %v73_v37 }
  0x2a   :  { %1967 = vmatprep.mubr.msk.f32.mxu1 %vm75_vm0, %v283_v38 }
  0x2c   :  { %1940 = vmatmul.mubr.msk.f32.gmra.mrb[14].mxu0 %vm75_vm0, %v74_v39 }
  0x2d   :  { %1968 = vmatmul.mubr.msk.f32.gmra.mrb[14].mxu1 %vm75_vm0, %v284_v40 }
  0xdd   :  { %v1948_v47 = vpop.f32.mrb[0].mxu1 }
  0xde   :  { %v399_v50 = vpop.f32.mrb[1].mxu1 }
  0xdf   :  { %1998 = vmatprep.mubr.msk.f32.mxu1 %vm479_vm1, %v399_v50 }
  0xe0   :  { %1999 = vmatmul.mubr.msk.f32.vlgmr.msra.gmra.mrb[16].mxu1 %vm479_vm1, %v1948_v47 }
  0xe1   :  { %v1951_v54 = vpop.f32.mrb[2].mxu1  ;;  %2156 = vmatpush3.bf16.msra.mxu1 %v2153_v24 }
  0xe2   :  { %v409_v57 = vpop.f32.mrb[3].mxu1  ;;  %2158 = vmatprep.subr.bf16.mxu1 %v2157_v26 }
  0xe3   :  { %v1920_v46 = vpop.f32.mrb[0].mxu0  ;;  %2001 = vmatprep.mubr.msk.f32.mxu1 %vm479_vm1, %v409_v57 }
  0xe4   :  { %v190_v48 = vpop.f32.mrb[1].mxu0  ;;  %2002 = vmatmul.mubr.msk.f32.gmra.mrb[18].mxu1 %vm479_vm1, %v1951_v54 }
  0xe5   :  { %1972 = vmatprep.mubr.msk.f32.mxu0 %vm479_vm1, %v190_v48  ;;  %2160 = vmatpush3.bf16.msra.mxu1 %v2157_v26 }
  0xe6   :  { %1973 = vmatmul.mubr.msk.f32.vlgmr.msra.gmra.mrb[16].mxu0 %vm479_vm1, %v1920_v46 }
  0xe7   :  { %v1923_v53 = vpop.f32.mrb[2].mxu0  ;;  %2140 = vmatpush3.bf16.msra.mxu0 %v2137_v43 }
  0xe8   :  { %v200_v55 = vpop.f32.mrb[3].mxu0  ;;  %2142 = vmatprep.subr.bf16.mxu0 %v2141_v49 }
  0xe9   :  { %1975 = vmatprep.mubr.msk.f32.mxu0 %vm479_vm1, %v200_v55 }
  0xea   :  { %1976 = vmatmul.mubr.msk.f32.gmra.mrb[18].mxu0 %vm479_vm1, %v1923_v53 }
  0xeb   :  { %v1926_v60 = vpop.f32.mrb[4].mxu0  ;;  %2144 = vmatpush3.bf16.msra.mxu0 %v2141_v49 }
  0xec   :  { %v1954_v61 = vpop.f32.mrb[4].mxu1  ;;  %v210_v62 = vpop.f32.mrb[5].mxu0  ;;  %2146 = vmatprep.subr.bf16.mxu0 %v2145_v56 }
  0xed   :  { %v419_v0 = vpop.f32.mrb[5].mxu1  ;;  %1978 = vmatprep.mubr.msk.f32.mxu0 %vm479_vm1, %v210_v62 }
  0xee   :  { %2004 = vmatprep.mubr.msk.f32.mxu1 %vm479_vm1, %v419_v0  ;;  %1979 = vmatmul.mubr.msk.f32.gmra.mrb[20].mxu0 %vm479_vm1, %v1926_v60 }
  0xef   :  { %2005 = vmatmul.mubr.msk.f32.gmra.mrb[20].mxu1 %vm479_vm1, %v1954_v61  ;;  %v1929_v1 = vpop.f32.mrb[6].mxu0  ;;  %2148 = vmatpush3.bf16.msra.mxu0 %v2145_v56 }
  0xf0   :  { %v1957_v2 = vpop.f32.mrb[6].mxu1  ;;  %v220_v3 = vpop.f32.mrb[7].mxu0  ;;  %2150 = vmatprep.subr.bf16.mxu0 %v2149_v63 }
  0xf1   :  { %v429_v4 = vpop.f32.mrb[7].mxu1  ;;  %1981 = vmatprep.mubr.msk.f32.mxu0 %vm479_vm1, %v220_v3 }
  0xf2   :  { %2007 = vmatprep.mubr.msk.f32.mxu1 %vm479_vm1, %v429_v4  ;;  %1982 = vmatmul.mubr.msk.f32.gmra.mrb[22].mxu0 %vm479_vm1, %v1929_v1 }
  0xf3   :  { %2008 = vmatmul.mubr.msk.f32.gmra.mrb[22].mxu1 %vm479_vm1, %v1957_v2  ;;  %v1932_v5 = vpop.f32.mrb[8].mxu0  ;;  %2152 = vmatpush3.bf16.msra.mxu0 %v2149_v63 }
  0xf4   :  { %v1960_v6 = vpop.f32.mrb[8].mxu1  ;;  %v230_v7 = vpop.f32.mrb[9].mxu0 }
  0xf5   :  { %v439_v8 = vpop.f32.mrb[9].mxu1  ;;  %1984 = vmatprep.mubr.msk.f32.mxu0 %vm479_vm1, %v230_v7 }
  0xf6   :  { %2010 = vmatprep.mubr.msk.f32.mxu1 %vm479_vm1, %v439_v8  ;;  %1985 = vmatmul.mubr.msk.f32.gmra.mrb[24].mxu0 %vm479_vm1, %v1932_v5 }
  0xf7   :  { %2011 = vmatmul.mubr.msk.f32.gmra.mrb[24].mxu1 %vm479_vm1, %v1960_v6  ;;  %v1935_v9 = vpop.f32.mrb[10].mxu0 }
  0xf8   :  { %v1963_v10 = vpop.f32.mrb[10].mxu1  ;;  %v240_v11 = vpop.f32.mrb[11].mxu0 }
  0xf9   :  { %v449_v12 = vpop.f32.mrb[11].mxu1  ;;  %1987 = vmatprep.mubr.msk.f32.mxu0 %vm479_vm1, %v240_v11  ;;  %v1746_v11 = vld [vmem:[%s2730_s10] ss:$0 sm:$0xff] }
  0xfa   :  { %2013 = vmatprep.mubr.msk.f32.mxu1 %vm479_vm1, %v449_v12  ;;  %1988 = vmatmul.mubr.msk.f32.gmra.mrb[26].mxu0 %vm479_vm1, %v1935_v9 }
  0xfb   :  { %2014 = vmatmul.mubr.msk.f32.gmra.mrb[26].mxu1 %vm479_vm1, %v1963_v10  ;;  %v1938_v13 = vpop.f32.mrb[12].mxu0 }
  0xfc   :  { %v1966_v14 = vpop.f32.mrb[12].mxu1  ;;  %v250_v15 = vpop.f32.mrb[13].mxu0 }
  0xfd   :  { %v459_v16 = vpop.f32.mrb[13].mxu1  ;;  %1990 = vmatprep.mubr.msk.f32.mxu0 %vm479_vm1, %v250_v15 }
  0xfe   :  { %2016 = vmatprep.mubr.msk.f32.mxu1 %vm479_vm1, %v459_v16  ;;  %1991 = vmatmul.mubr.msk.f32.gmra.mrb[28].mxu0 %vm479_vm1, %v1938_v13 }
  0xff   :  { %2017 = vmatmul.mubr.msk.f32.gmra.mrb[28].mxu1 %vm479_vm1, %v1966_v14  ;;  %v1941_v17 = vpop.f32.mrb[14].mxu0 }
 0x100   :  { %v1969_v18 = vpop.f32.mrb[14].mxu1  ;;  %v260_v19 = vpop.f32.mrb[15].mxu0 }
 0x101   :  { %v469_v20 = vpop.f32.mrb[15].mxu1  ;;  %1993 = vmatprep.mubr.msk.f32.mxu0 %vm479_vm1, %v260_v19 }
 0x102   :  { %2019 = vmatprep.mubr.msk.f32.mxu1 %vm479_vm1, %v469_v20  ;;  %1994 = vmatmul.mubr.msk.f32.gmra.mrb[30].mxu0 %vm479_vm1, %v1941_v17 }
 0x103   :  { %2020 = vmatmul.mubr.msk.f32.gmra.mrb[30].mxu1 %vm479_vm1, %v1969_v18 }
 0x1b3   :  { %v2000_v28 = vpop.f32.mrb[16].mxu1 }
 0x1b4   :  { %v788_v31 = vpop.f32.mrb[17].mxu1 }
 0x1b7   :  { %v2003_v34 = vpop.f32.mrb[18].mxu1 }
 0x1b8   :  { %v798_v37 = vpop.f32.mrb[19].mxu1 }
 0x1b9   :  { %v1974_v27 = vpop.f32.mrb[16].mxu0 }
 0x1ba   :  { %v594_v29 = vpop.f32.mrb[17].mxu0  ;;  %v868_v30 = vmul.f32 %v2000_v28, %v1974_v27 }
 0x1bb   :  { %v867_v32 = vmul.f32 %v788_v31, %v594_v29 }
 0x1bd   :  { %v1977_v33 = vpop.f32.mrb[18].mxu0  ;;  %2038 = vmatprep.mubr.msk.f32.mxu0 %vm898_vm2, %v867_v32 }
 0x1be   :  { %v604_v35 = vpop.f32.mrb[19].mxu0  ;;  %v870_v36 = vmul.f32 %v2003_v34, %v1977_v33  ;;  %2039 = vmatmul.mubr.msk.f32.vlgmr.msra.gmra.mrb[32].mxu0 %vm898_vm2, %v868_v30 }
 0x1bf   :  { %v869_v38 = vmul.f32 %v798_v37, %v604_v35 }
 0x1c1   :  { %v1980_v39 = vpop.f32.mrb[20].mxu0  ;;  %2041 = vmatprep.mubr.msk.f32.mxu0 %vm898_vm2, %v869_v38 }
 0x1c2   :  { %v2006_v40 = vpop.f32.mrb[20].mxu1  ;;  %v614_v41 = vpop.f32.mrb[21].mxu0  ;;  %2042 = vmatmul.mubr.msk.f32.gmra.mrb[34].mxu0 %vm898_vm2, %v870_v36 }
 0x1c3   :  { %v872_v42 = vmul.f32 %v2006_v40, %v1980_v39  ;;  %v808_v43 = vpop.f32.mrb[21].mxu1 }
 0x1c4   :  { %v871_v44 = vmul.f32 %v808_v43, %v614_v41 }
 0x1c5   :  { %v1983_v45 = vpop.f32.mrb[22].mxu0 }
 0x1c6   :  { %2044 = vmatprep.mubr.msk.f32.mxu0 %vm898_vm2, %v871_v44  ;;  %v2009_v46 = vpop.f32.mrb[22].mxu1  ;;  %v624_v47 = vpop.f32.mrb[23].mxu0 }
 0x1c7   :  { %2045 = vmatmul.mubr.msk.f32.gmra.mrb[36].mxu0 %vm898_vm2, %v872_v42  ;;  %v874_v48 = vmul.f32 %v2009_v46, %v1983_v45  ;;  %v818_v49 = vpop.f32.mrb[23].mxu1 }
 0x1c8   :  { %v873_v50 = vmul.f32 %v818_v49, %v624_v47 }
 0x1c9   :  { %v1986_v51 = vpop.f32.mrb[24].mxu0 }
 0x1ca   :  { %v2012_v52 = vpop.f32.mrb[24].mxu1  ;;  %2047 = vmatprep.mubr.msk.f32.mxu0 %vm898_vm2, %v873_v50  ;;  %v634_v53 = vpop.f32.mrb[25].mxu0 }
 0x1cb   :  { %v876_v54 = vmul.f32 %v2012_v52, %v1986_v51  ;;  %v828_v55 = vpop.f32.mrb[25].mxu1  ;;  %2048 = vmatmul.mubr.msk.f32.gmra.mrb[38].mxu0 %vm898_vm2, %v874_v48 }
 0x1cc   :  { %v875_v56 = vmul.f32 %v828_v55, %v634_v53 }
 0x1cd   :  { %v1989_v57 = vpop.f32.mrb[26].mxu0 }
 0x1ce   :  { %v2015_v58 = vpop.f32.mrb[26].mxu1  ;;  %2050 = vmatprep.mubr.msk.f32.mxu0 %vm898_vm2, %v875_v56  ;;  %v644_v59 = vpop.f32.mrb[27].mxu0 }
 0x1cf   :  { %v878_v60 = vmul.f32 %v2015_v58, %v1989_v57  ;;  %v838_v61 = vpop.f32.mrb[27].mxu1  ;;  %2051 = vmatmul.mubr.msk.f32.gmra.mrb[40].mxu0 %vm898_vm2, %v876_v54 }
 0x1d0   :  { %v877_v62 = vmul.f32 %v838_v61, %v644_v59 }
 0x1d1   :  { %v1992_v63 = vpop.f32.mrb[28].mxu0 }
 0x1d2   :  { %v2018_v0 = vpop.f32.mrb[28].mxu1  ;;  %2053 = vmatprep.mubr.msk.f32.mxu0 %vm898_vm2, %v877_v62  ;;  %v654_v1 = vpop.f32.mrb[29].mxu0 }
 0x1d3   :  { %v880_v2 = vmul.f32 %v2018_v0, %v1992_v63  ;;  %v848_v3 = vpop.f32.mrb[29].mxu1  ;;  %2054 = vmatmul.mubr.msk.f32.gmra.mrb[42].mxu0 %vm898_vm2, %v878_v60  ;;  %v2575_v60 = vld [vmem:[%s2732_s12] ss:$0 sm:$0xff] }
 0x1d4   :  { %v879_v4 = vmul.f32 %v848_v3, %v654_v1  ;;  %v2582_v1 = vld [vmem:[%s2733_s13] ss:$0 sm:$0xff] }
 0x1d5   :  { %v1995_v5 = vpop.f32.mrb[30].mxu0 }
 0x1d6   :  { %v2021_v6 = vpop.f32.mrb[30].mxu1  ;;  %2056 = vmatprep.mubr.msk.f32.mxu0 %vm898_vm2, %v879_v4  ;;  %v664_v7 = vpop.f32.mrb[31].mxu0 }
 0x1d7   :  { %v882_v8 = vmul.f32 %v2021_v6, %v1995_v5  ;;  %v858_v9 = vpop.f32.mrb[31].mxu1  ;;  %2057 = vmatmul.mubr.msk.f32.gmra.mrb[44].mxu0 %vm898_vm2, %v880_v2 }
 0x1d8   :  { %v881_v10 = vmul.f32 %v858_v9, %v664_v7 }
 0x1da   :  { %2059 = vmatprep.mubr.msk.f32.mxu0 %vm898_vm2, %v881_v10 }
 0x1db   :  { %2060 = vmatmul.mubr.msk.f32.gmra.mrb[46].mxu0 %vm898_vm2, %v882_v8 }
 0x291   :  { %v2040_v12 = vpop.f32.mrb[32].mxu0 }
 0x292   :  { %v1019_v13 = vadd.f32 %v2040_v12, %v1746_v11  ;;  %v1013_v14 = vpop.f32.mrb[33].mxu0 }
 0x293   :  { %v1014_v15 = vadd.f32 %v1746_v11, %v1013_v14 }
 0x294   :  { %v1093_v18 = vmax.f32 %v1019_v13, 0.0 }
 0x295   :  { %v1092_v16 = vmax.f32 %v1014_v15, 0.0  ;;  %v2043_v17 = vpop.f32.mrb[34].mxu0 }
 0x296   :  { %v1029_v19 = vadd.f32 %v2043_v17, %v1746_v11  ;;  %v1023_v20 = vpop.f32.mrb[35].mxu0 }
 0x297   :  { %v1024_v21 = vadd.f32 %v1746_v11, %v1023_v20  ;;  %2070 = vmatprep.mubr.msk.f32.mxu1 %vm1119_vm3, %v1092_v16 }
 0x298   :  { %v1095_v22 = vmax.f32 %v1029_v19, 0.0  ;;  %2071 = vmatmul.mubr.msk.f32.vlgmr.msra.gmra.mrb[32].mxu1 %vm1119_vm3, %v1093_v18 }
 0x299   :  { %v1094_v23 = vmax.f32 %v1024_v21, 0.0 }
 0x29a   :  { %v2046_v24 = vpop.f32.mrb[36].mxu0 }
 0x29b   :  { %v1039_v25 = vadd.f32 %v2046_v24, %v1746_v11  ;;  %v1033_v26 = vpop.f32.mrb[37].mxu0  ;;  %2073 = vmatprep.mubr.msk.f32.mxu1 %vm1119_vm3, %v1094_v23 }
 0x29c   :  { %v1034_v27 = vadd.f32 %v1746_v11, %v1033_v26  ;;  %2074 = vmatmul.mubr.msk.f32.gmra.mrb[34].mxu1 %vm1119_vm3, %v1095_v22 }
 0x29d   :  { %v1097_v28 = vmax.f32 %v1039_v25, 0.0 }
 0x29e   :  { %v1096_v29 = vmax.f32 %v1034_v27, 0.0  ;;  %v2049_v30 = vpop.f32.mrb[38].mxu0 }
 0x29f   :  { %v1049_v31 = vadd.f32 %v2049_v30, %v1746_v11  ;;  %v1043_v32 = vpop.f32.mrb[39].mxu0 }
 0x2a0   :  { %2076 = vmatprep.mubr.msk.f32.mxu1 %vm1119_vm3, %v1096_v29  ;;  %v1044_v33 = vadd.f32 %v1746_v11, %v1043_v32 }
 0x2a1   :  { %v1099_v34 = vmax.f32 %v1049_v31, 0.0  ;;  %2077 = vmatmul.mubr.msk.f32.gmra.mrb[36].mxu1 %vm1119_vm3, %v1097_v28 }
 0x2a2   :  { %v1098_v35 = vmax.f32 %v1044_v33, 0.0  ;;  %v2052_v36 = vpop.f32.mrb[40].mxu0 }
 0x2a3   :  { %v1059_v37 = vadd.f32 %v2052_v36, %v1746_v11  ;;  %v1053_v38 = vpop.f32.mrb[41].mxu0 }
 0x2a4   :  { %v1054_v39 = vadd.f32 %v1746_v11, %v1053_v38  ;;  %2079 = vmatprep.mubr.msk.f32.mxu1 %vm1119_vm3, %v1098_v35 }
 0x2a5   :  { %v1101_v40 = vmax.f32 %v1059_v37, 0.0  ;;  %2080 = vmatmul.mubr.msk.f32.gmra.mrb[38].mxu1 %vm1119_vm3, %v1099_v34 }
 0x2a6   :  { %v1100_v41 = vmax.f32 %v1054_v39, 0.0  ;;  %v2055_v42 = vpop.f32.mrb[42].mxu0 }
 0x2a7   :  { %v1069_v43 = vadd.f32 %v2055_v42, %v1746_v11  ;;  %v1063_v44 = vpop.f32.mrb[43].mxu0 }
 0x2a8   :  { %v1064_v45 = vadd.f32 %v1746_v11, %v1063_v44  ;;  %2082 = vmatprep.mubr.msk.f32.mxu1 %vm1119_vm3, %v1100_v41 }
 0x2a9   :  { %v1103_v46 = vmax.f32 %v1069_v43, 0.0  ;;  %2083 = vmatmul.mubr.msk.f32.gmra.mrb[40].mxu1 %vm1119_vm3, %v1101_v40 }
 0x2aa   :  { %v1102_v47 = vmax.f32 %v1064_v45, 0.0  ;;  %v2058_v48 = vpop.f32.mrb[44].mxu0 }
 0x2ab   :  { %v1079_v49 = vadd.f32 %v2058_v48, %v1746_v11  ;;  %v1073_v50 = vpop.f32.mrb[45].mxu0 }
 0x2ac   :  { %v1074_v51 = vadd.f32 %v1746_v11, %v1073_v50  ;;  %2085 = vmatprep.mubr.msk.f32.mxu1 %vm1119_vm3, %v1102_v47 }
 0x2ad   :  { %v1105_v52 = vmax.f32 %v1079_v49, 0.0  ;;  %2086 = vmatmul.mubr.msk.f32.gmra.mrb[42].mxu1 %vm1119_vm3, %v1103_v46 }
 0x2ae   :  { %v1104_v53 = vmax.f32 %v1074_v51, 0.0  ;;  %v2061_v54 = vpop.f32.mrb[46].mxu0 }
 0x2af   :  { %v1089_v55 = vadd.f32 %v2061_v54, %v1746_v11  ;;  %v1083_v56 = vpop.f32.mrb[47].mxu0  ;;  %v2231_v54 = vmov 0  }
 0x2b0   :  { %v1084_v57 = vadd.f32 %v1746_v11, %v1083_v56  ;;  %2088 = vmatprep.mubr.msk.f32.mxu1 %vm1119_vm3, %v1104_v53  ;;  %2197 = vset.pattern.permute.xlu0 %v2231_v54 }
 0x2b1   :  { %v1107_v58 = vmax.f32 %v1089_v55, 0.0  ;;  %2089 = vmatmul.mubr.msk.f32.gmra.mrb[44].mxu1 %vm1119_vm3, %v1105_v52  ;;  %2198 = vset.pattern.permute.xlu1 %v2231_v54 }
 0x2b2   :  { %v1106_v59 = vmax.f32 %v1084_v57, 0.0 }
 0x2b4   :  { %2091 = vmatprep.mubr.msk.f32.mxu1 %vm1119_vm3, %v1106_v59 }
 0x2b5   :  { %2092 = vmatmul.mubr.msk.f32.gmra.mrb[46].mxu1 %vm1119_vm3, %v1107_v58 }
 0x36b   :  { %v2072_v61 = vpop.f32.mrb[32].mxu1 }
 0x36c   :  { %v1240_v62 = vadd.f32 %v2072_v61, %v2575_v60  ;;  %v1234_v63 = vpop.f32.mrb[33].mxu1 }
 0x36d   :  { %v1235_v0 = vadd.f32 %v2575_v60, %v1234_v63 }
 0x36e   :  { %v1314_v2 = vmax.f32 %v1240_v62, 0.0 }
 0x36f   :  { %v1313_v3 = vmax.f32 %v1235_v0, 0.0  ;;  %v2075_v4 = vpop.f32.mrb[34].mxu1 }
 0x370   :  { %v1250_v5 = vadd.f32 %v2075_v4, %v2575_v60  ;;  %v1244_v6 = vpop.f32.mrb[35].mxu1  ;;  %v1337_v13 = vmul.f32 %v2582_v1, %v1314_v2 }
 0x371   :  { %v1245_v7 = vadd.f32 %v2575_v60, %v1244_v6  ;;  %v1336_v8 = vmul.f32 %v2582_v1, %v1313_v3 }
 0x372   :  { %v1316_v9 = vmax.f32 %v1250_v5, 0.0  ;;  %v1355_v22 = vsel %vm1119_vm3, %v1337_v13, 0.0 }
 0x373   :  { %v1315_v10 = vmax.f32 %v1245_v7, 0.0  ;;  %v1352_v11 = vsel %vm1119_vm3, %v1336_v8, 0.0 }
 0x374   :  { %v2078_v12 = vpop.f32.mrb[36].mxu1  ;;  %1353 = vadd.xlane.f32.xlu0 %v1352_v11  ;;  %v1339_v16 = vmul.f32 %v2582_v1, %v1316_v9 }
 0x375   :  { %v1260_v14 = vadd.f32 %v2078_v12, %v2575_v60  ;;  %v1254_v15 = vpop.f32.mrb[37].mxu1  ;;  %v1338_v20 = vmul.f32 %v2582_v1, %v1315_v10 }
 0x376   :  { %v1255_v17 = vadd.f32 %v2575_v60, %v1254_v15  ;;  %v1361_v19 = vsel %vm1119_vm3, %v1339_v16, 0.0 }
 0x377   :  { %v1318_v18 = vmax.f32 %v1260_v14, 0.0  ;;  %1362 = vadd.xlane.f32.xlu1 %v1361_v19  ;;  %v1358_v30 = vsel %vm1119_vm3, %v1338_v20, 0.0 }
 0x378   :  { %v1317_v21 = vmax.f32 %v1255_v17, 0.0  ;;  %v2081_v23 = vpop.f32.mrb[38].mxu1  ;;  %1356 = vadd.xlane.f32.xlu0 %v1355_v22 }
 0x379   :  { %v1270_v24 = vadd.f32 %v2081_v23, %v2575_v60  ;;  %v1264_v25 = vpop.f32.mrb[39].mxu1  ;;  %v1341_v26 = vmul.f32 %v2582_v1, %v1318_v18 }
 0x37a   :  { %v1265_v27 = vadd.f32 %v2575_v60, %v1264_v25  ;;  %v1340_v28 = vmul.f32 %v2582_v1, %v1317_v21 }
 0x37b   :  { %v1320_v29 = vmax.f32 %v1270_v24, 0.0  ;;  %1359 = vadd.xlane.f32.xlu1 %v1358_v30  ;;  %v1367_v35 = vsel %vm1119_vm3, %v1341_v26, 0.0 }
 0x37c   :  { %v1319_v31 = vmax.f32 %v1265_v27, 0.0  ;;  %v1364_v32 = vsel %vm1119_vm3, %v1340_v28, 0.0  ;;  %v2084_v33 = vpop.f32.mrb[40].mxu1 }
 0x37d   :  { %1365 = vadd.xlane.f32.xlu0 %v1364_v32  ;;  %v1280_v34 = vadd.f32 %v2084_v33, %v2575_v60  ;;  %v1274_v36 = vpop.f32.mrb[41].mxu1  ;;  %v1343_v37 = vmul.f32 %v2582_v1, %v1320_v29 }
 0x37e   :  { %v1275_v38 = vadd.f32 %v2575_v60, %v1274_v36  ;;  %v1342_v39 = vmul.f32 %v2582_v1, %v1319_v31 }
 0x37f   :  { %v1322_v40 = vmax.f32 %v1280_v34, 0.0  ;;  %1368 = vadd.xlane.f32.xlu1 %v1367_v35  ;;  %v1373_v45 = vsel %vm1119_vm3, %v1343_v37, 0.0 }
 0x380   :  { %v1321_v41 = vmax.f32 %v1275_v38, 0.0  ;;  %v2087_v42 = vpop.f32.mrb[42].mxu1  ;;  %v1370_v43 = vsel %vm1119_vm3, %v1342_v39, 0.0 }
 0x381   :  { %v1290_v44 = vadd.f32 %v2087_v42, %v2575_v60  ;;  %v1284_v46 = vpop.f32.mrb[43].mxu1  ;;  %1371 = vadd.xlane.f32.xlu0 %v1370_v43  ;;  %v1345_v47 = vmul.f32 %v2582_v1, %v1322_v40 }
 0x382   :  { %v1285_v48 = vadd.f32 %v2575_v60, %v1284_v46  ;;  %v1344_v49 = vmul.f32 %v2582_v1, %v1321_v41 }
 0x383   :  { %v1324_v50 = vmax.f32 %v1290_v44, 0.0  ;;  %1374 = vadd.xlane.f32.xlu1 %v1373_v45  ;;  %v1379_v56 = vsel %vm1119_vm3, %v1345_v47, 0.0 }
 0x384   :  { %v1323_v51 = vmax.f32 %v1285_v48, 0.0  ;;  %v2090_v52 = vpop.f32.mrb[44].mxu1  ;;  %v1376_v53 = vsel %vm1119_vm3, %v1344_v49, 0.0  ;;  %v1423_v48 = vld [vmem:[%s2727_s7] sm:$0xff] }
 0x385   :  { %v1300_v55 = vadd.f32 %v2090_v52, %v2575_v60  ;;  %v1294_v57 = vpop.f32.mrb[45].mxu1  ;;  %v1347_v58 = vmul.f32 %v2582_v1, %v1324_v50  ;;  %1377 = vadd.xlane.f32.xlu0 %v1376_v53  ;;  %2126 = vmatprep.mubr.f32.mxu0 %v1423_v48  ;;  %v1425_v49 = vld [vmem:[%s2728_s8] sm:$0xff] }
 0x386   :  { %v1295_v59 = vadd.f32 %v2575_v60, %v1294_v57  ;;  %v1346_v61 = vmul.f32 %v2582_v1, %v1323_v51  ;;  %v1426_v51 = vld [vmem:[%s2728_s8 + $0x8] sm:$0xff]  ;;  %v1428_v57 = vld [vmem:[%s2728_s8 + $0x18] sm:$0xff] }
 0x387   :  { %v1326_v62 = vmax.f32 %v1300_v55, 0.0  ;;  %1380 = vadd.xlane.f32.xlu1 %v1379_v56  ;;  %v1385_v3 = vsel %vm1119_vm3, %v1347_v58, 0.0  ;;  %v1427_v58 = vld [vmem:[%s2728_s8 + $0x10] sm:$0xff] }
 0x388   :  { %v1325_v63 = vmax.f32 %v1295_v59, 0.0  ;;  %v2093_v0 = vpop.f32.mrb[46].mxu1  ;;  %v1382_v2 = vsel %vm1119_vm3, %v1346_v61, 0.0 }
 0x389   :  { %v1310_v4 = vadd.f32 %v2093_v0, %v2575_v60  ;;  %v1349_v5 = vmul.f32 %v2582_v1, %v1326_v62  ;;  %1383 = vadd.xlane.f32.xlu0 %v1382_v2  ;;  %v1304_v6 = vpop.f32.mrb[47].mxu1  ;;  %v1430_v2 = vld [vmem:[%s2728_s8 + $0x28] sm:$0xff] }
 0x38a   :  { %v1305_v7 = vadd.f32 %v2575_v60, %v1304_v6  ;;  %v1348_v8 = vmul.f32 %v2582_v1, %v1325_v63  ;;  %v1781_v60 = vld [vmem:[#allocation2] ss:$0 sm:$0xff] }
 0x38b   :  { %v1328_v9 = vmax.f32 %v1310_v4, 0.0  ;;  %1386 = vadd.xlane.f32.xlu1 %v1385_v3  ;;  %v1391_v12 = vsel %vm1119_vm3, %v1349_v5, 0.0  ;;  %v1429_v3 = vld [vmem:[%s2728_s8 + $0x20] sm:$0xff] }
 0x38c   :  { %v1327_v10 = vmax.f32 %v1305_v7, 0.0  ;;  %v1388_v11 = vsel %vm1119_vm3, %v1348_v8, 0.0 }
 0x38d   :  { %v1351_v13 = vmul.f32 %v2582_v1, %v1328_v9  ;;  %1389 = vadd.xlane.f32.xlu0 %v1388_v11  ;;  %v1431_v11 = vld [vmem:[%s2728_s8 + $0x30] sm:$0xff] }
 0x38e   :  { %v1350_v14 = vmul.f32 %v2582_v1, %v1327_v10  ;;  %v1432_v10 = vld [vmem:[%s2728_s8 + $0x38] sm:$0xff] }
 0x38f   :  { %1392 = vadd.xlane.f32.xlu1 %v1391_v12  ;;  %v1397_v16 = vsel %vm1119_vm3, %v1351_v13, 0.0 }
 0x390   :  { %v1394_v15 = vsel %vm1119_vm3, %v1350_v14, 0.0 }
 0x391   :  { %1395 = vadd.xlane.f32.xlu0 %v1394_v15  ;;  %v1434_v15 = vld [vmem:[%s2728_s8 + $0x48] sm:$0xff] }
 0x393   :  { %1398 = vadd.xlane.f32.xlu1 %v1397_v16 }
 0x401   :  { %v1354_v17 = vpop.xlane.xlu0 %1353 }
 0x402   :  { %v1407_v18 = vadd.f32 %v1781_v60, %v1354_v17 }
 0x404   :  { %v1363_v19 = vpop.xlane.xlu1 %1362  ;;  %1443 = vperm.xlu0 %2197, %v1407_v18  }
 0x405   :  { %v1357_v20 = vpop.xlane.xlu0 %1356  ;;  %v1410_v23 = vadd.f32 %v1781_v60, %v1363_v19 }
 0x406   :  { %v1408_v21 = vadd.f32 %v1781_v60, %v1357_v20 }
 0x408   :  { %v1360_v22 = vpop.xlane.xlu1 %1359  ;;  %1448 = vperm.xlu1 %2198, %v1408_v21   ;;  %v1436_v21 = vld [vmem:[%s2728_s8 + $0x58] sm:$0xff] }
 0x409   :  { %v1409_v1 = vadd.f32 %v1781_v60, %v1360_v22  ;;  %v1435_v22 = vld [vmem:[%s2728_s8 + $0x50] sm:$0xff] }
 0x40a   :  { %v1366_v26 = vpop.xlane.xlu0 %1365 }
 0x40b   :  { %v1411_v31 = vadd.f32 %v1781_v60, %v1366_v26 }
 0x40c   :  { %v1369_v24 = vpop.xlane.xlu1 %1368  ;;  %1458 = vperm.xlu1 %2198, %v1410_v23  }
 0x40d   :  { %v1412_v27 = vadd.f32 %v1781_v60, %v1369_v24 }
 0x40e   :  { %v1372_v29 = vpop.xlane.xlu0 %1371 }
 0x40f   :  { %v1413_v38 = vadd.f32 %v1781_v60, %v1372_v29 }
 0x410   :  { %v1375_v25 = vpop.xlane.xlu1 %1374  ;;  %1453 = vperm.xlu1 %2198, %v1409_v1  }
 0x411   :  { %v1414_v35 = vadd.f32 %v1781_v60, %v1375_v25 }
 0x412   :  { %v1378_v34 = vpop.xlane.xlu0 %1377 }
 0x413   :  { %v1415_v42 = vadd.f32 %v1781_v60, %v1378_v34 }
 0x414   :  { %v1381_v28 = vpop.xlane.xlu1 %1380  ;;  %1468 = vperm.xlu1 %2198, %v1412_v27   ;;  %v1438_v27 = vld [vmem:[%s2728_s8 + $0x68] sm:$0xff] }
 0x415   :  { %v1416_v30 = vadd.f32 %v1781_v60, %v1381_v28  ;;  %v1437_v28 = vld [vmem:[%s2728_s8 + $0x60] sm:$0xff] }
 0x416   :  { %v1384_v39 = vpop.xlane.xlu0 %1383 }
 0x417   :  { %1488 = vperm.xlu0 %2197, %v1416_v30   ;;  %v1417_v44 = vadd.f32 %v1781_v60, %v1384_v39 }
 0x418   :  { %v1387_v32 = vpop.xlane.xlu1 %1386  ;;  %1463 = vperm.xlu1 %2198, %v1411_v31  }
 0x419   :  { %v1418_v33 = vadd.f32 %v1781_v60, %v1387_v32 }
 0x41a   :  { %v1390_v43 = vpop.xlane.xlu0 %1389 }
 0x41b   :  { %1498 = vperm.xlu0 %2197, %v1418_v33   ;;  %v1419_v45 = vadd.f32 %v1781_v60, %v1390_v43  ;;  %v1440_v33 = vld [vmem:[%s2728_s8 + $0x78] sm:$0xff] }
 0x41c   :  { %v1393_v36 = vpop.xlane.xlu1 %1392  ;;  %1478 = vperm.xlu1 %2198, %v1414_v35   ;;  %v1439_v35 = vld [vmem:[%s2728_s8 + $0x70] sm:$0xff] }
 0x41d   :  { %v1420_v37 = vadd.f32 %v1781_v60, %v1393_v36 }
 0x41e   :  { %v1396_v46 = vpop.xlane.xlu0 %1395 }
 0x41f   :  { %1508 = vperm.xlu0 %2197, %v1420_v37   ;;  %v1421_v47 = vadd.f32 %v1781_v60, %v1396_v46 }
 0x420   :  { %1473 = vperm.xlu1 %2198, %v1413_v38   ;;  %v1399_v40 = vpop.xlane.xlu1 %1398 }
 0x421   :  { %v1422_v41 = vadd.f32 %v1781_v60, %v1399_v40  ;;  %v1433_v60 = vld [vmem:[%s2728_s8 + $0x40] sm:$0xff] }
 0x423   :  { %1518 = vperm.xlu0 %2197, %v1422_v41   ;;  %v1424_v41 = vld [vmem:[%s2727_s7 + $0x8] sm:$0xff] }
 0x424   :  { %1483 = vperm.xlu1 %2198, %v1415_v42  }
 0x428   :  { %1493 = vperm.xlu1 %2198, %v1417_v44  }
 0x42c   :  { %1503 = vperm.xlu1 %2198, %v1419_v45  }
 0x430   :  { %1513 = vperm.xlu1 %2198, %v1421_v47  }
 0x483   :  { %v1444_v50 = vpop.permute.xlu0 %1443 }
 0x484   :  { %v1521_v53 = vmul.f32 %v1444_v50, %v1425_v49 }
 0x487   :  { %v1449_v52 = vpop.permute.xlu1 %1448 }
 0x488   :  { %v1522_v54 = vmul.f32 %v1449_v52, %v1426_v51 }
 0x48a   :  { %v2161_v55 = vpack.c.bf16 %v1522_v54, %v1521_v53 }
 0x48b   :  { %v1459_v56 = vpop.permute.xlu1 %1458 }
 0x48c   :  { %2162 = vmatprep.subr.bf16.mxu0 %v2161_v55  ;;  %v1524_v61 = vmul.f32 %v1459_v56, %v1428_v57 }
 0x48d   :  { %2164 = vmatpush3.bf16.msra.mxu0 %v2161_v55 }
 0x48f   :  { %v1454_v59 = vpop.permute.xlu1 %1453 }
 0x490   :  { %v1523_v62 = vmul.f32 %v1454_v59, %v1427_v58 }
 0x492   :  { %v2165_v63 = vpack.c.bf16 %v1524_v61, %v1523_v62 }
 0x493   :  { %v1469_v0 = vpop.permute.xlu1 %1468 }
 0x494   :  { %2166 = vmatprep.subr.bf16.mxu0 %v2165_v63  ;;  %v1526_v5 = vmul.f32 %v1469_v0, %v1430_v2  ;;  %v1643_v2 = vld [vmem:[%s2722_s2 + $0x8] sm:$0xff] }
 0x495   :  { %2168 = vmatpush3.bf16.msra.mxu0 %v2165_v63 }
 0x496   :  { %v1489_v8 = vpop.permute.xlu0 %1488 }
 0x497   :  { %v1464_v4 = vpop.permute.xlu1 %1463  ;;  %v1530_v19 = vmul.f32 %v1489_v8, %v1434_v15 }
 0x498   :  { %v1525_v6 = vmul.f32 %v1464_v4, %v1429_v3  ;;  %v1642_v3 = vld [vmem:[%s2722_s2] sm:$0xff]  ;;  %v1651_v4 = vsel %vm479_vm1, %v1643_v2, 0.0 }
 0x49a   :  { %v2169_v7 = vpack.c.bf16 %v1526_v5, %v1525_v6  ;;  %v1499_v16 = vpop.permute.xlu0 %1498  ;;  %v1644_v5 = vsel %vm479_vm1, %v1642_v3, 0.0  ;;  %v1652_v6 = vrot.slane %v1651_v4, 4 }
 0x49b   :  { %v1479_v9 = vpop.permute.xlu1 %1478  ;;  %v1532_v25 = vmul.f32 %v1499_v16, %v1436_v21 }
 0x49c   :  { %2170 = vmatprep.subr.bf16.mxu0 %v2169_v7  ;;  %v1528_v13 = vmul.f32 %v1479_v9, %v1432_v10  ;;  %v1653_v8 = vadd.f32 %v1652_v6, %v1651_v4 }
 0x49d   :  { %2172 = vmatpush3.bf16.msra.mxu0 %v2169_v7  ;;  %v1645_v7 = vrot.slane %v1644_v5, 4 }
 0x49e   :  { %v1509_v24 = vpop.permute.xlu0 %1508  ;;  %v1654_v10 = vrot.slane %v1653_v8, 2 }
 0x49f   :  { %v1474_v12 = vpop.permute.xlu1 %1473  ;;  %v1534_v31 = vmul.f32 %v1509_v24, %v1438_v27  ;;  %v1646_v9 = vadd.f32 %v1645_v7, %v1644_v5 }
 0x4a0   :  { %v1527_v14 = vmul.f32 %v1474_v12, %v1431_v11  ;;  %v1655_v12 = vadd.f32 %v1654_v10, %v1653_v8 }
 0x4a1   :  { %v1647_v11 = vrot.slane %v1646_v9, 2 }
 0x4a2   :  { %v2173_v17 = vpack.c.bf16 %v1528_v13, %v1527_v14  ;;  %v1519_v34 = vpop.permute.xlu0 %1518  ;;  %v1656_v14 = vrot.slane %v1655_v12, 1 }
 0x4a3   :  { %v1484_v18 = vpop.permute.xlu1 %1483  ;;  %v1536_v38 = vmul.f32 %v1519_v34, %v1440_v33  ;;  %v1648_v13 = vadd.f32 %v1647_v11, %v1646_v9 }
 0x4a4   :  { %v1529_v20 = vmul.f32 %v1484_v18, %v1433_v60  ;;  %2174 = vmatprep.subr.bf16.mxu0 %v2173_v17  ;;  %v1657_v16 = vadd.f32 %v1656_v14, %v1655_v12 }
 0x4a5   :  { %2176 = vmatpush3.bf16.msra.mxu0 %v2173_v17  ;;  %v1649_v15 = vrot.slane %v1648_v13, 1 }
 0x4a6   :  { %v2177_v23 = vpack.c.bf16 %v1530_v19, %v1529_v20 }
 0x4a7   :  { %v1494_v1 = vpop.permute.xlu1 %1493  ;;  %v1650_v60 = vadd.f32 %v1649_v15, %v1648_v13 }
 0x4a8   :  { %v1531_v26 = vmul.f32 %v1494_v1, %v1435_v22  ;;  %2178 = vmatprep.subr.bf16.mxu0 %v2177_v23 }
 0x4a9   :  { %2180 = vmatpush3.bf16.msra.mxu0 %v2177_v23 }
 0x4aa   :  { %v2181_v29 = vpack.c.bf16 %v1532_v25, %v1531_v26 }
 0x4ab   :  { %v1504_v30 = vpop.permute.xlu1 %1503 }
 0x4ac   :  { %v1533_v32 = vmul.f32 %v1504_v30, %v1437_v28  ;;  %2182 = vmatprep.subr.bf16.mxu0 %v2181_v29 }
 0x4ad   :  { %2184 = vmatpush3.bf16.msra.mxu0 %v2181_v29 }
 0x4ae   :  { %v2185_v36 = vpack.c.bf16 %v1534_v31, %v1533_v32 }
 0x4af   :  { %v1514_v37 = vpop.permute.xlu1 %1513 }
 0x4b0   :  { %v1535_v39 = vmul.f32 %v1514_v37, %v1439_v35  ;;  %2186 = vmatprep.subr.bf16.mxu0 %v2185_v36 }
 0x4b1   :  { %2188 = vmatpush3.bf16.msra.mxu0 %v2185_v36 }
 0x4b2   :  { %v2189_v40 = vpack.c.bf16 %v1536_v38, %v1535_v39 }
 0x4b4   :  { %2190 = vmatprep.subr.bf16.mxu0 %v2189_v40 }
 0x4b5   :  { %2192 = vmatpush3.bf16.msra.mxu0 %v2189_v40 }
 0x4b8   :  { %2127 = vmatmul.mubr.f32.vlgmr.msra.gmra.mrb[48].mxu0 %v1424_v41 }
 0x58b   :  { %v2128_v42 = vpop.f32.mrb[48].mxu0 }
 0x58c   :  { %v1603_v43 = vpop.f32.mrb[49].mxu0  ;;  %v1615_v44 = vsel %vm479_vm1, %v2128_v42, -inf }
 0x58d   :  { %1616 = vmax.xlane.f32.xlu0 %v1615_v44  ;;  %v1612_v45 = vsel %vm479_vm1, %v1603_v43, -inf }
 0x58e   :  { %1613 = vmax.xlane.f32.xlu1 %v1612_v45 }
 0x61a   :  { %v1617_v46 = vpop.xlane.xlu0 %1616 }
 0x61b   :  { %v1619_v47 = vsub.f32 %v2128_v42, %v1617_v46  ;;  %v1614_v48 = vpop.xlane.xlu1 %1613 }
 0x61c   :  { %v1618_v49 = vsub.f32 %v1603_v43, %v1614_v48 }
 0x61d   :  { %v1622_v50 = vmul.f32 1.442695, %v1619_v47 }
 0x61e   :  { %v1620_v51 = vmul.f32 1.442695, %v1618_v49 }
 0x61f   :  { %2199 = vpow2.f32 %v1622_v50 }
 0x620   :  { %2201 = vpow2.f32 %v1620_v51 }
 0x629   :  { %v2200_v52 = vpop.eup %2199 }
 0x62a   :  { %v2202_v53 = vpop.eup %2201  ;;  %v1627_v54 = vsel %vm479_vm1, %v2200_v52, 0.0 }
 0x62b   :  { %1628 = vadd.xlane.f32.xlu1 %v1627_v54  ;;  %v1624_v55 = vsel %vm479_vm1, %v2202_v53, 0.0 }
 0x62c   :  { %1625 = vadd.xlane.f32.xlu0 %v1624_v55 }
 0x6b8   :  { %v1629_v56 = vpop.xlane.xlu1 %1628 }
 0x6b9   :  { %2203 = vrcp.f32 %v1629_v56  ;;  %v1626_v57 = vpop.xlane.xlu0 %1625 }
 0x6ba   :  { %2205 = vrcp.f32 %v1626_v57 }
 0x6c3   :  { %v2204_v58 = vpop.eup %2203 }
 0x6c4   :  { %v2206_v59 = vpop.eup %2205  ;;  %v1633_v61 = vmul.f32 %v2204_v58, %v2200_v52 }
 0x6c5   :  { %v1632_v62 = vmul.f32 %v2206_v59, %v2202_v53 }
 0x6c6   :  { %v1639_v63 = vsel %vm479_vm1, %v1633_v61, 0.0  ;;  %1635 = vst.msk [vmem:[%s2736_s16 + $0x8] sm:$0xff] %vm479_vm1, %v1633_v61 }
 0x6c7   :  { %1640 = vadd.xlane.f32.xlu1 %v1639_v63  ;;  %v1636_v0 = vsel %vm479_vm1, %v1632_v62, 0.0  ;;  %1634 = vst.msk [vmem:[%s2736_s16] sm:$0xff] %vm479_vm1, %v1632_v62  ;;  %s2232_s16 = smov [#allocation3]  }
 0x6c8   :  { %1637 = vadd.xlane.f32.xlu0 %v1636_v0  ;;  %s1667_s26 = sshll.u32 %s2232_s16, 4  ;;  %s1668_s26 = int_to_ptr.vmem [resolvable:$true] %s1667_s26 }
 0x6c9   :  { %s2207_s2 = scalar_lea.vmem %s1668_s26, 256  ;;  %p2212_p1 = scmp.lt.s32.totalorder %s1668_s26, %s1668_s26 }
 0x6ca   :  { %p2208_p0 = scmp.ne.s32.totalorder %s1668_s26, %s2207_s2  ;;  %p2213_p2 = scmp.lt.s32.totalorder %s2207_s2, %s2207_s2 }
 0x6cc   :  { %p2214_p3 = por %p2213_p2, %p2212_p1 }
 0x6ce   :  { %p2215_p4 = pnand %p2214_p3, %p2208_p0 }
 0x754   :  { %v1641_v17 = vpop.xlane.xlu1 %1640 }
 0x755   :  { %v1659_v18 = vmul.f32 %v1657_v16, %v1641_v17  ;;  %v1638_v19 = vpop.xlane.xlu0 %1637 }
 0x756   :  { %v1658_v20 = vmul.f32 %v1650_v60, %v1638_v19 }
 0x757   :  { %1661 = vst.msk [vmem:[#allocation3 + $0x8] sm:$0xff] %vm479_vm1, %v1659_v18 }
 0x758   :  { %1660 = vst.msk [vmem:[#allocation3] sm:$0xff] %vm479_vm1, %v1658_v20 }
 0x759   :  { %2218 = shalt.err (!%p2215_p4)
}
 0x75a   :  { %s2219_s29 = scalar_lea.hbm %s2735_s15, 256 }
 0x75b   :  { %p2220_p5 = scmp.ne.s32.totalorder %s2735_s15, %s2219_s29  ;;  %p2223_p6 = scmp.lt.u32.totalorder %s2219_s29, %s2735_s15 }
 0x75d   :  { %p2225_p7 = pnand %p2223_p6, %p2220_p5 }
 0x75f   :  { %2228 = shalt.err (!%p2225_p7)
}
 0x760   :  { %s2233_s3 = smov 128   ;;  %s2234_s30 = smov 8  }
 0x761   :  { %1673 = dma.vmem_to_hbm [thread:$0]  %s1668_s26, 256, %s2735_s15, [#allocation4], %s2233_s3, %s2233_s3, %s2234_s30  }
 0x762   :  { %2229 = dma.done.wait [#allocation4], 256  }
 0x763   :  { %2230 = vsyncadd [#allocation4], 4294967040 }
 0x764   :  { %1681 = vsyncpa [#allocation4], 1 }

</bundles_post_ra>
